<compile_context>
chip_gen: v7x
topology: tpu7x:2x2x1
jax: 0.10.0
libtpu: 0.0.40
codegen_flags: <defaults>
</compile_context>

<pallas_src>
import jax
import jax.numpy as jnp
from jax.experimental import pallas as pl
from jax.experimental.pallas import tpu as pltpu


def _broadcast_vocab_kernel(vocab_ref, out_ref):
    # vocab_ref: (num_classes, max_word_len) uint8 — constant index_map, so it
    #            is DMA'd once and stays resident across grid steps.
    # out_ref:   (TB, num_classes, max_word_len) uint8 — TB batch rows per step.
    out_ref[...] = jnp.broadcast_to(vocab_ref[...][None, :, :], out_ref.shape)


def imagenet_vocabulary_forward(
    vocab_codes: jax.Array,
    batch_size: int,
    *,
    tile_budget_bytes: int = 4 << 20,  # per output tile; 2x (double buffer)
                                       # stays well under v7x's 32 MiB scoped VMEM
) -> jax.Array:
    """Broadcast the encoded vocabulary across the batch with a Pallas kernel.

    Args:
        vocab_codes: uint8 (num_classes, max_word_len) character codes;
                     max_word_len must be a multiple of 128 (lane-dense output).
        batch_size:  number of images in the batch (>= 1).

    Returns:
        uint8 (batch_size, num_classes, max_word_len).
    """
    num_classes, max_word_len = vocab_codes.shape
    assert max_word_len % 128 == 0, "pad max_word_len to a multiple of 128"
    batch_size = max(int(batch_size), 1)  # mirrors `max(len(images_z), 1)`

    # Rows per grid step: as many as fit the VMEM tile budget, capped by batch.
    row_bytes = num_classes * max_word_len * jnp.dtype(vocab_codes.dtype).itemsize
    tb = max(1, min(batch_size, tile_budget_bytes // max(row_bytes, 1)))
    grid = (pl.cdiv(batch_size, tb),)

    return pl.pallas_call(
        _broadcast_vocab_kernel,
        out_shape=jax.ShapeDtypeStruct(
            (batch_size, num_classes, max_word_len), vocab_codes.dtype
        ),
        grid=grid,
        in_specs=[
            # Full vocabulary block, same tile for every batch step
            # (constant index_map => fetched once, kept resident).
            pl.BlockSpec((num_classes, max_word_len), lambda b: (0, 0)),
        ],
        out_specs=pl.BlockSpec(
            (tb, num_classes, max_word_len), lambda b: (b, 0, 0)
        ),
        compiler_params=pltpu.CompilerParams(
            dimension_semantics=("parallel",),
            vmem_limit_bytes=64 << 20,
        ),
    )(vocab_codes)


def _build_synthetic_vocab(num_classes: int, max_word_len: int):
    """Deterministic synthetic ImageNet-style class names + uint8 encoding."""
    import numpy as np

    words = [f"imagenet_class_{i:04d}" for i in range(num_classes)]
    codes = np.zeros((num_classes, max_word_len), dtype=np.uint8)
    for r, w in enumerate(words):
        b = [ord(c) for c in w][:max_word_len]
        codes[r, : len(b)] = b
    return words, jnp.asarray(codes)


def _decode(result) -> list[list[str]]:
    """Decode uint8 char codes back into list[list[str]] (the module's output)."""
    import numpy as np

    arr = np.asarray(result)
    out = []
    for b in range(arr.shape[0]):
        row_words = []
        for r in range(arr.shape[1]):
            chars = [chr(int(v)) for v in arr[b, r] if int(v) != 0]
            row_words.append("".join(chars))
        out.append(row_words)
    return out


if __name__ == "__main__":
    key = jax.random.PRNGKey(0)

    # Small, forward-consistent shapes: a batch of 2 image embeddings
    # ("images_z") whose length determines batch_size; values are unused,
    # exactly as in the PyTorch module.
    batch, embed_dim = 2, 32
    images_z = jax.random.normal(key, (batch, embed_dim), dtype=jnp.float32)

    num_classes, max_word_len = 16, 128  # small stand-in for 1000 ImageNet classes
    words, vocab_codes = _build_synthetic_vocab(num_classes, max_word_len)

    batch_size = max(images_z.shape[0], 1)
    result = imagenet_vocabulary_forward(vocab_codes, batch_size)
    result = jax.block_until_ready(result)

    # Decode and check semantics: every batch item gets the identical vocabulary.
    decoded = _decode(result)
    expected = [words] * batch_size
    assert decoded == expected, "Pallas broadcast does not match reference forward"

    print("KERNEL_OK")
</pallas_src>

<mosaic_0001>
module attributes {stable_mosaic.version = 11 : i64} {
  func.func @_broadcast_vocab_kernel(%arg0: i32, %arg1: memref<16x128xi8, #tpu.memory_space<vmem>>, %arg2: memref<2x16x128xi8, #tpu.memory_space<vmem>>) attributes {dimension_semantics = [#tpu.dimension_semantics<parallel>], iteration_bounds = array<i64: 1>, scalar_prefetch = 0 : i64, scratch_operands = 0 : i64, tpu.core_type = #tpu.core_type<tc>, window_params = [{pipeline_mode = #tpu.pipeline_mode<synchronous>, transform_indices = @transform_0, window_bounds = array<i64: 16, 128>}, {transform_indices = @transform_1, window_bounds = array<i64: 2, 16, 128>}]} {
    %c0 = arith.constant 0 : index
    %c0_0 = arith.constant 0 : index
    %0 = vector.load %arg1[%c0, %c0_0] : memref<16x128xi8, #tpu.memory_space<vmem>>, vector<16x128xi8>
    %1 = vector.shape_cast %0 : vector<16x128xi8> to vector<1x16x128xi8>
    %2 = vector.shape_cast %1 : vector<1x16x128xi8> to vector<1x16x128xi8>
    %3 = vector.broadcast %2 : vector<1x16x128xi8> to vector<2x16x128xi8>
    %c0_1 = arith.constant 0 : index
    %c0_2 = arith.constant 0 : index
    %c0_3 = arith.constant 0 : index
    %4 = vector.load %arg2[%c0_1, %c0_2, %c0_3] : memref<2x16x128xi8, #tpu.memory_space<vmem>>, vector<2x16x128xi8>
    tpu.vector_store %arg2[%c0_1, %c0_2, %c0_3], %3 {strides = array<i32>} : memref<2x16x128xi8, #tpu.memory_space<vmem>>, vector<2x16x128xi8>,
    return
  }
  func.func @transform_0(%arg0: i32) -> (i32, i32) {
    %c0_i32 = arith.constant 0 : i32
    %c0_i32_0 = arith.constant 0 : i32
    %c0_i32_1 = arith.constant 0 : i32
    return %c0_i32, %c0_i32_0 : i32, i32
  }
  func.func @transform_1(%arg0: i32) -> (i32, i32, i32) {
    %c0_i32 = arith.constant 0 : i32
    %c0_i32_0 = arith.constant 0 : i32
    %c0_i32_1 = arith.constant 0 : i32
    return %arg0, %c0_i32, %c0_i32_0 : i32, i32, i32
  }
}

</mosaic_0001>

<bundles_post_ra>
// kernel: tpu_custom_call.1
= control target key start
LH: loop header
LB: loop body
LE: loop exit
PB: predicated region body
PF: predicated region fallthrough
CT: control target
= control target key end

     0   :  { %6 = vsyncpa [#allocation3], 0  ;;  %s136_s0 = inlined_call_operand.hbm [shape: u8[16,128], index: 0, kind: input, shape index: {}]   ;;  %s137_s1 = inlined_call_operand.hbm [shape: u8[2,16,128], index: 1, kind: output, shape index: {}]  }
   0x1   :  { %7 = vsyncpa [#allocation4], 0  ;;  %s98_s6 = smov [#allocation2]   ;;  %s50_s10 = scalar_lea.hbm %s136_s0, 64 }
   0x2   :  { %s13_s7 = sshll.u32 %s98_s6, 4  ;;  %p51_p0 = scmp.ne.s32.totalorder %s136_s0, %s50_s10  ;;  %s14_s7 = int_to_ptr.vmem [resolvable:$true] %s13_s7 }
   0x3   :  { %p54_p1 = scmp.lt.u32.totalorder %s50_s10, %s136_s0 }
   0x5   :  { %p56_p2 = pnand %p54_p1, %p51_p0 }
   0x7   :  { %59 = shalt.err (!%p56_p2)
}
   0x8   :  { %s60_s15 = scalar_lea.vmem %s14_s7, 64  ;;  %p65_p4 = scmp.lt.s32.totalorder %s14_s7, %s14_s7 }
   0x9   :  { %p61_p3 = scmp.ne.s32.totalorder %s14_s7, %s60_s15  ;;  %p66_p5 = scmp.lt.s32.totalorder %s60_s15, %s60_s15 }
   0xb   :  { %p67_p6 = por %p66_p5, %p65_p4 }
   0xd   :  { %p68_p7 = pnand %p67_p6, %p61_p3 }
   0xf   :  { %71 = shalt.err (!%p68_p7)
}
  0x10   :  { %s99_s16 = smov 32   ;;  %s100_s17 = smov 2  }
  0x11   :  { %19 = dma.hbm_to_vmem [thread:$0]  %s136_s0, 64, %s14_s7, [#allocation3], %s99_s16, %s99_s16, %s100_s17  }
  0x12   :  { %94 = dma.done.wait [#allocation3], 64  }
  0x13   :  { %95 = vsyncadd [#allocation3], 4294967232  ;;  %s101_s20 = smov [#allocation5]   ;;  %v23_v0 = vld [vmem:[#allocation2] sm:$0x3] }
  0x14   :  { %s34_s21 = sshll.u32 %s101_s20, 4  ;;  %v24_v1 = vld [vmem:[#allocation2 + $0x2] sm:$0x3]  ;;  %25 = vst [vmem:[#allocation5] sm:$0x3] %v23_v0  ;;  %s35_s21 = int_to_ptr.vmem [resolvable:$true] %s34_s21 }
  0x15   :  { %27 = vst [vmem:[#allocation5 + $0x4] sm:$0x3] %v23_v0  ;;  %26 = vst [vmem:[#allocation5 + $0x2] sm:$0x3] %v24_v1  ;;  %s72_s22 = scalar_lea.vmem %s35_s21, 128  ;;  %p77_p9 = scmp.lt.s32.totalorder %s35_s21, %s35_s21 }
  0x16   :  { %28 = vst [vmem:[#allocation5 + $0x6] sm:$0x3] %v24_v1  ;;  %p73_p8 = scmp.ne.s32.totalorder %s35_s21, %s72_s22  ;;  %p78_p10 = scmp.lt.s32.totalorder %s72_s22, %s72_s22 }
  0x18   :  { %p79_p11 = por %p78_p10, %p77_p9 }
  0x1a   :  { %p80_p12 = pnand %p79_p11, %p73_p8 }
  0x1c   :  { %83 = shalt.err (!%p80_p12)
}
  0x1d   :  { %s84_s24 = scalar_lea.hbm %s137_s1, 128 }
  0x1e   :  { %p85_p13 = scmp.ne.s32.totalorder %s137_s1, %s84_s24  ;;  %p88_p0 = scmp.lt.u32.totalorder %s84_s24, %s137_s1 }
  0x20   :  { %p90_p1 = pnand %p88_p0, %p85_p13 }
  0x22   :  { %93 = shalt.err (!%p90_p1)
}
  0x23   :  { %40 = dma.vmem_to_hbm [thread:$0]  %s35_s21, 128, %s137_s1, [#allocation4], %s99_s16, %s99_s16, %s100_s17  }
  0x24   :  { %96 = dma.done.wait [#allocation4], 128  }
  0x25   :  { %97 = vsyncadd [#allocation4], 4294967168 }
  0x26   :  { %44 = vsyncpa [#allocation3], 1 }
  0x27   :  { %45 = vsyncpa [#allocation4], 1 }

</bundles_post_ra>
